<compile_context>
chip_gen: v5e
topology: v5e:2x2
jax: 0.10.0
libtpu: 0.0.40
codegen_flags: <defaults>
</compile_context>

<pallas_src>
import jax
import jax.numpy as jnp
from jax.experimental import pallas as pl
from jax.experimental.pallas import tpu as pltpu


def _round_up(x, m):
    return ((x + m - 1) // m) * m


def _linear_tanh_kernel(x_ref, w_ref, b_ref, o_ref, acc_ref):
    """One (i, j, k) grid step: accumulate x_tile @ w_tile; finalize at k==last."""
    k = pl.program_id(2)

    @pl.when(k == 0)
    def _init():
        acc_ref[...] = jnp.zeros_like(acc_ref)

    # bf16 operands -> f32 accumulation on the MXU.
    acc_ref[...] += jnp.dot(
        x_ref[...], w_ref[...], preferred_element_type=jnp.float32
    )

    @pl.when(k == pl.num_programs(2) - 1)
    def _finalize():
        y = acc_ref[...] + b_ref[...]          # bias added exactly once per tile
        # dropout (eval mode) == identity
        o_ref[...] = jnp.tanh(y).astype(o_ref.dtype)


def linear_tanh(x, weight_t, bias, *, tm=None, tn=None, tk=None):
    """x: (B, K) f32, weight_t: (K, N) f32 (pre-transposed), bias: (N,) f32 -> (B, N) f32."""
    B, K = x.shape
    Kw, N = weight_t.shape
    assert K == Kw and bias.shape == (N,)

    # MXU-friendly tiles: tm multiple of 8, tn/tk multiples of 128 (lane-dense
    # output stores, aligned vmatmul). Capped so small problems stay small but
    # large Linear layers get real pipelining.
    tm = tm if tm is not None else min(256, _round_up(B, 8))
    tn = tn if tn is not None else min(256, _round_up(N, 128))
    tk = tk if tk is not None else min(512, _round_up(K, 128))

    Mp = _round_up(B, tm)
    Kp = _round_up(K, tk)
    Np = _round_up(N, tn)

    # Zero-pad (padded K region contributes 0 to the dot), cast MXU inputs to bf16.
    x_p = jnp.pad(x, ((0, Mp - B), (0, Kp - K))).astype(jnp.bfloat16)
    w_p = jnp.pad(weight_t, ((0, Kp - K), (0, Np - N))).astype(jnp.bfloat16)
    b_p = jnp.pad(bias, (0, Np - N)).astype(jnp.float32).reshape(1, Np)

    grid = (Mp // tm, Np // tn, Kp // tk)

    cost = pl.CostEstimate(
        flops=2 * Mp * Kp * Np,
        transcendentals=Mp * Np,  # tanh
        bytes_accessed=(x_p.size * 2 + w_p.size * 2 + b_p.size * 4 + Mp * Np * 4),
    )

    out_padded = pl.pallas_call(
        _linear_tanh_kernel,
        out_shape=jax.ShapeDtypeStruct((Mp, Np), x.dtype),
        grid_spec=pltpu.PrefetchScalarGridSpec(
            num_scalar_prefetch=0,
            grid=grid,
            in_specs=[
                pl.BlockSpec((tm, tk), lambda i, j, k: (i, k)),   # x tile
                pl.BlockSpec((tk, tn), lambda i, j, k: (k, j)),   # W^T tile
                pl.BlockSpec((1, tn), lambda i, j, k: (0, j)),    # bias tile (by j only)
            ],
            out_specs=pl.BlockSpec((tm, tn), lambda i, j, k: (i, j)),
            scratch_shapes=[pltpu.VMEM((tm, tn), jnp.float32)],
        ),
        compiler_params=pltpu.CompilerParams(
            # M/N parallel (megacore sharding on v7x), K reduction arbitrary.
            dimension_semantics=("parallel", "parallel", "arbitrary"),
        ),
        cost_estimate=cost,
    )(x_p, w_p, b_p)

    return out_padded[:B, :N]


if __name__ == "__main__":
    # Small shapes implied by the module: a 2-D (batch, features) input.
    batch = 8
    input_size = 32
    output_size = 16
    dropout_p = 0.5  # unused at inference (identity)

    key = jax.random.PRNGKey(0)
    kx, kw, kb = jax.random.split(key, 3)

    # PyTorch-style uniform(-1/sqrt(K), 1/sqrt(K)) init.
    bound = 1.0 / (input_size ** 0.5)
    weight = jax.random.uniform(
        kw, (output_size, input_size), jnp.float32, -bound, bound
    )
    bias = jax.random.uniform(kb, (output_size,), jnp.float32, -bound, bound)
    x = jax.random.normal(kx, (batch, input_size), jnp.float32)

    # Store the weight pre-transposed once (no per-forward HBM transpose).
    weight_t = jnp.asarray(weight.T)  # (input_size, output_size)

    fwd = jax.jit(linear_tanh)
    out = fwd(x, weight_t, bias)
    out = jax.block_until_ready(out)

    # Pure-JAX f32 reference (eval-mode dropout == identity). Tolerance covers
    # the bf16 MXU operand cast (accumulation is f32).
    ref = jnp.tanh(x @ weight.T + bias)
    assert out.shape == (batch, output_size)
    assert jnp.allclose(out, ref, atol=2e-2, rtol=2e-2), "mismatch vs reference"

    print("KERNEL_OK")
</pallas_src>

<mosaic_0001>
module attributes {stable_mosaic.version = 11 : i64} {
  func.func @_linear_tanh_kernel(%arg0: i32, %arg1: i32, %arg2: i32, %arg3: memref<8x128xbf16, #tpu.memory_space<vmem>>, %arg4: memref<128x128xbf16, #tpu.memory_space<vmem>>, %arg5: memref<1x128xf32, #tpu.memory_space<vmem>>, %arg6: memref<8x128xf32, #tpu.memory_space<vmem>>, %arg7: memref<8x128xf32, #tpu.memory_space<vmem>>) attributes {dimension_semantics = [#tpu.dimension_semantics<parallel>, #tpu.dimension_semantics<parallel>, #tpu.dimension_semantics<arbitrary>], iteration_bounds = array<i64: 1, 1, 1>, scalar_prefetch = 0 : i64, scratch_operands = 1 : i64, tpu.core_type = #tpu.core_type<tc>, window_params = [{transform_indices = @transform_0, window_bounds = array<i64: 8, 128>}, {transform_indices = @transform_1, window_bounds = array<i64: 128, 128>}, {transform_indices = @transform_2, window_bounds = array<i64: 1, 128>}, {transform_indices = @transform_3, window_bounds = array<i64: 8, 128>}]} {
    %c0_i32 = arith.constant 0 : i32
    %0 = arith.cmpi eq, %arg2, %c0_i32 : i32
    %1 = arith.extui %0 : i1 to i32
    %c0_i32_0 = arith.constant 0 : i32
    %2 = arith.cmpi ne, %1, %c0_i32_0 : i32
    scf.if %2 {
      %cst_10 = arith.constant 0.000000e+00 : f32
      %12 = vector.broadcast %cst_10 : f32 to vector<8x128xf32>
      %c0_11 = arith.constant 0 : index
      %c0_12 = arith.constant 0 : index
      %13 = vector.load %arg7[%c0_11, %c0_12] : memref<8x128xf32, #tpu.memory_space<vmem>>, vector<8x128xf32>
      tpu.vector_store %arg7[%c0_11, %c0_12], %12 {strides = array<i32>} : memref<8x128xf32, #tpu.memory_space<vmem>>, vector<8x128xf32>,
    } else {
    }
    %c0 = arith.constant 0 : index
    %c0_1 = arith.constant 0 : index
    %3 = vector.load %arg7[%c0, %c0_1] : memref<8x128xf32, #tpu.memory_space<vmem>>, vector<8x128xf32>
    %c0_2 = arith.constant 0 : index
    %c0_3 = arith.constant 0 : index
    %4 = vector.load %arg3[%c0_2, %c0_3] : memref<8x128xbf16, #tpu.memory_space<vmem>>, vector<8x128xbf16>
    %c0_4 = arith.constant 0 : index
    %c0_5 = arith.constant 0 : index
    %5 = vector.load %arg4[%c0_4, %c0_5] : memref<128x128xbf16, #tpu.memory_space<vmem>>, vector<128x128xbf16>
    %cst = arith.constant dense<0.000000e+00> : vector<8x128xf32>
    %6 = tpu.matmul %4, %5, %cst {dimension_numbers = #tpu.dot_dimension_numbers<[1], [0], [0], [1], [0, 0, 1, 1], [], []>} : vector<8x128xbf16>, vector<128x128xbf16>, vector<8x128xf32> -> vector<8x128xf32>
    %7 = arith.addf %3, %6 : vector<8x128xf32>
    %c0_6 = arith.constant 0 : index
    %c0_7 = arith.constant 0 : index
    %8 = vector.load %arg7[%c0_6, %c0_7] : memref<8x128xf32, #tpu.memory_space<vmem>>, vector<8x128xf32>
    tpu.vector_store %arg7[%c0_6, %c0_7], %7 {strides = array<i32>} : memref<8x128xf32, #tpu.memory_space<vmem>>, vector<8x128xf32>,
    %c0_i32_8 = arith.constant 0 : i32
    %9 = arith.cmpi eq, %arg2, %c0_i32_8 : i32
    %10 = arith.extui %9 : i1 to i32
    %c0_i32_9 = arith.constant 0 : i32
    %11 = arith.cmpi ne, %10, %c0_i32_9 : i32
    scf.if %11 {
      %c0_10 = arith.constant 0 : index
      %c0_11 = arith.constant 0 : index
      %12 = vector.load %arg7[%c0_10, %c0_11] : memref<8x128xf32, #tpu.memory_space<vmem>>, vector<8x128xf32>
      %c0_12 = arith.constant 0 : index
      %c0_13 = arith.constant 0 : index
      %13 = vector.load %arg5[%c0_12, %c0_13] : memref<1x128xf32, #tpu.memory_space<vmem>>, vector<1x128xf32>
      %14 = vector.broadcast %13 : vector<1x128xf32> to vector<8x128xf32>
      %15 = arith.addf %12, %14 : vector<8x128xf32>
      %16 = math.tanh %15 : vector<8x128xf32>
      %c0_14 = arith.constant 0 : index
      %c0_15 = arith.constant 0 : index
      %17 = vector.load %arg6[%c0_14, %c0_15] : memref<8x128xf32, #tpu.memory_space<vmem>>, vector<8x128xf32>
      tpu.vector_store %arg6[%c0_14, %c0_15], %16 {strides = array<i32>} : memref<8x128xf32, #tpu.memory_space<vmem>>, vector<8x128xf32>,
    } else {
    }
    return
  }
  func.func @transform_0(%arg0: i32, %arg1: i32, %arg2: i32) -> (i32, i32) {
    %c0_i32 = arith.constant 0 : i32
    return %arg0, %arg2 : i32, i32
  }
  func.func @transform_1(%arg0: i32, %arg1: i32, %arg2: i32) -> (i32, i32) {
    %c0_i32 = arith.constant 0 : i32
    return %arg2, %arg1 : i32, i32
  }
  func.func @transform_2(%arg0: i32, %arg1: i32, %arg2: i32) -> (i32, i32) {
    %c0_i32 = arith.constant 0 : i32
    %c0_i32_0 = arith.constant 0 : i32
    return %c0_i32, %arg1 : i32, i32
  }
  func.func @transform_3(%arg0: i32, %arg1: i32, %arg2: i32) -> (i32, i32) {
    %c0_i32 = arith.constant 0 : i32
    return %arg0, %arg1 : i32, i32
  }
}

</mosaic_0001>

<bundles_post_ra>
// kernel: linear_tanh.1
= control target key start
LH: loop header
LB: loop body
LE: loop exit
PB: predicated region body
PF: predicated region fallthrough
CT: control target
= control target key end

     0   :  { %s252_s0 = inlined_call_operand.vmem [shape: bf16[8,128], index: 0, kind: input, shape index: {}]   ;;  %s253_s1 = inlined_call_operand.vmem [shape: bf16[128,128], index: 1, kind: input, shape index: {}]   ;;  %s254_s2 = inlined_call_operand.vmem [shape: f32[1,128], index: 2, kind: input, shape index: {}]   ;;  %s255_s3 = inlined_call_operand.hbm [shape: f32[8,128], index: 3, kind: output, shape index: {}]  }
   0x1   :  { %v167_v0 = vld [vmem:[%s253_s1 + $0x38] sm:$0xff]  ;;  %v166_v1 = vld [vmem:[%s253_s1 + $0x30] sm:$0xff] }
   0x2   :  { %86 = vmatpush.bf16.msra.mxu0 %v167_v0 }
   0x3   :  { %8 = vsyncpa [#allocation4], 0  ;;  %v165_v2 = vld [vmem:[%s253_s1 + $0x28] sm:$0xff]  ;;  %v164_v3 = vld [vmem:[%s253_s1 + $0x20] sm:$0xff]  ;;  %s198_s5 = smov [#allocation3]   ;;  %s119_s9 = sshll.u32 %s255_s3, 4  ;;  %s120_s9 = int_to_ptr.hbm [resolvable:$true] %s119_s9 }
   0x4   :  { %v163_v4 = vld [vmem:[%s253_s1 + $0x18] sm:$0xff]  ;;  %v162_v5 = vld [vmem:[%s253_s1 + $0x10] sm:$0xff]  ;;  %v161_v6 = vld [vmem:[%s253_s1 + $0x8] sm:$0xff]  ;;  %s117_s6 = sshll.u32 %s198_s5, 4  ;;  %s118_s6 = int_to_ptr.vmem [resolvable:$true] %s117_s6 }
   0x5   :  { %v160_v7 = vld [vmem:[%s253_s1] sm:$0xff] }
   0x6   :  { %87 = vmatpush.bf16.msra.mxu0 %v166_v1  ;;  %v21_v8 = vld [vmem:[%s252_s0] sm:$0xf] }
   0x7   :  { %v169_v9 = vld [vmem:[%s254_s2] ss:$0 sm:$0xff] }
   0xa   :  { %88 = vmatpush.bf16.msra.mxu0 %v165_v2 }
   0xe   :  { %89 = vmatpush.bf16.msra.mxu0 %v164_v3 }
  0x12   :  { %90 = vmatpush.bf16.msra.mxu0 %v163_v4 }
  0x16   :  { %91 = vmatpush.bf16.msra.mxu0 %v162_v5 }
  0x1a   :  { %92 = vmatpush.bf16.msra.mxu0 %v161_v6 }
  0x1e   :  { %93 = vmatpush.bf16.msra.mxu0 %v160_v7 }
  0x21   :  { %94 = vmatmul.bf16.vlgmr.msra.gmra.mxu0 %v21_v8 }
  0x9e   :  { %v95_v10 = vpop.f32.mrf.mxu0 }
  0x9f   :  { %v109_v11 = vadd.f32 %v169_v9, %v95_v10 }
  0xa1   :  { %170 = vtanh.f32 %v109_v11 }
  0xa6   :  { %v97_v12 = vpop.f32.mrf.mxu0 }
  0xa7   :  { %v171_v13 = vpop.eup %170 }
  0xa8   :  { %111 = vst [vmem:[#allocation3] sm:$0xff] %v171_v13 }
  0xa9   :  { %122 = dma.vmem_to_hbm [thread:$0]  %s118_s6, 128, %s120_s9, [#allocation4]  }
  0xaa   :  { %196 = dma.done.wait [#allocation4], 128  }
  0xab   :  { %197 = vsyncadd [#allocation4], 4294967168 }
  0xac   :  { %127 = vsyncpa [#allocation4], 1 }

</bundles_post_ra>
